<compile_context>
chip_gen: v6e
topology: v6e:2x2x1
jax: 0.10.0
libtpu: 0.0.40
codegen_flags: <defaults>
</compile_context>

<pallas_src>
import functools

import jax
import jax.numpy as jnp
from jax.experimental import pallas as pl
from jax.experimental.pallas import tpu as pltpu

_MASK_VALUE = -1e30  # large finite negative; avoids NaN on fully-masked rows


def _sdpa_kernel(*refs, temperature, has_mask, compute_dtype, approx_recip):
    if has_mask:
        q_ref, k_ref, v_ref, mask_ref, out_ref, attn_ref = refs
    else:
        q_ref, k_ref, v_ref, out_ref, attn_ref = refs
        mask_ref = None

    inv_temp = 1.0 / float(temperature)

    # Scale q (TQ*D elements) instead of the TQ*Lk score matrix; scale in f32, then cast.
    q = (q_ref[0].astype(jnp.float32) * inv_temp).astype(compute_dtype)  # (TQ, D)
    k = k_ref[0].astype(compute_dtype)                                   # (Lk, D)
    v = v_ref[0].astype(compute_dtype)                                   # (Lk, D)

    # scores = q @ k^T without an explicit transpose: contract the D axis of both operands.
    scores = jax.lax.dot_general(
        q, k,
        dimension_numbers=(((1,), (1,)), ((), ())),
        preferred_element_type=jnp.float32,
    )  # (TQ, Lk), f32

    if mask_ref is not None:
        m = mask_ref[0]
        pred = m if m.dtype == jnp.bool_ else (m != 0)
        scores = jnp.where(pred, _MASK_VALUE, scores)

    # Softmax over the last axis (torch dim=2); elementwise math in f32.
    row_max = jnp.max(scores, axis=-1, keepdims=True)
    exps = jnp.exp(scores - row_max)
    denom = jnp.sum(exps, axis=-1, keepdims=True)
    inv_denom = pl.reciprocal(denom, approx=approx_recip)  # (TQ, 1); EUP when approx
    attn = exps * inv_denom                                # (TQ, Lk), f32

    attn_ref[0] = attn.astype(attn_ref.dtype)

    # output = attn @ v (MXU, f32 accumulation)
    out = jnp.dot(attn.astype(compute_dtype), v, preferred_element_type=jnp.float32)
    out_ref[0] = out.astype(out_ref.dtype)


def _vmem_budget_bytes():
    """~85% of physical VMEM; conservative 64 MiB (v7x per-TC) fallback."""
    cap = None
    try:
        cap = getattr(pltpu.get_tpu_info(), "vmem_capacity_bytes", None)
    except Exception:  # pragma: no cover - defensive (e.g. interpret mode quirks)
        cap = None
    if not cap:
        cap = 64 * 2**20
    return int(0.85 * int(cap))


def _pick_q_tile(lq, lk, d, itemsizes, budget, target):
    """Largest q tile (multiple of 128, else 8) fitting the double-buffered VMEM budget."""
    qb, kvb, ob, ab, mb = itemsizes
    fixed = 2 * lk * d * (2 * kvb)                               # K + V blocks, 2-deep
    per_row = 2 * (d * (qb + ob) + lk * (ab + mb)) + 8 * lk      # + f32 score/exp temps
    avail = budget - fixed - (2 << 20)
    max_tq = max(8, avail // per_row) if per_row > 0 else target
    limit = max(8, min(int(target), int(max_tq)))
    if lq <= limit:
        return lq                       # full-extent block: always a legal block dim
    if limit >= 128:
        return (limit // 128) * 128     # lane/sublane friendly
    return (limit // 8) * 8


def scaled_dot_product_attention(q, k, v, temperature, mask=None, *,
                                 block_q=256, compute_dtype=jnp.bfloat16,
                                 attn_dtype=jnp.bfloat16, attn_out_buffers=2):
    """q, k, v: [B, L, D]. mask: optional [B, Lq, Lk] / [1, Lq, Lk] / [Lq, Lk] (True => mask)."""
    B, Lq, D = q.shape
    _, Lk, _ = k.shape
    has_mask = mask is not None

    mask_shared = False
    mb = 0
    if has_mask:
        if mask.ndim == 2:
            mask = mask[None]                                   # (1, Lq, Lk) shared mask
        if mask.dtype not in (jnp.bool_, jnp.int8, jnp.uint8):
            mask = mask.astype(jnp.int8)                        # only cast wide dtypes
        mask_shared = mask.shape[0] == 1
        mb = 1

    qb = jnp.dtype(q.dtype).itemsize
    kvb = jnp.dtype(k.dtype).itemsize
    ob = qb                                                     # out dtype == q dtype
    ab = jnp.dtype(attn_dtype).itemsize

    budget = _vmem_budget_bytes()
    tq = _pick_q_tile(Lq, Lk, D, (qb, kvb, ob, ab, mb), budget, block_q)
    grid = (B, pl.cdiv(Lq, tq))

    in_specs = [
        pl.BlockSpec((1, tq, D), lambda b, i: (b, i, 0)),       # q tile
        pl.BlockSpec((1, Lk, D), lambda b, i: (b, 0, 0)),       # k (full, revisited over i)
        pl.BlockSpec((1, Lk, D), lambda b, i: (b, 0, 0)),       # v (full, revisited over i)
    ]
    args = [q, k, v]
    if has_mask:
        if mask_shared:
            in_specs.append(pl.BlockSpec((1, tq, Lk), lambda b, i: (0, i, 0)))
        else:
            in_specs.append(pl.BlockSpec((1, tq, Lk), lambda b, i: (b, i, 0)))
        args.append(mask)

    attn_spec_kwargs = {}
    if attn_out_buffers != 2:  # e.g. 3 on v5e if xprof shows exposed attn-writeback DMA
        attn_spec_kwargs["pipeline_mode"] = pl.Buffered(attn_out_buffers)
    out_specs = [
        pl.BlockSpec((1, tq, D), lambda b, i: (b, i, 0)),
        pl.BlockSpec((1, tq, Lk), lambda b, i: (b, i, 0), **attn_spec_kwargs),
    ]

    # Per-step footprint: (K+V) + tq*(q+out+attn+mask) blocks, double-buffered, + f32 temps.
    blk = Lk * D * 2 * kvb + tq * (D * (qb + ob) + Lk * (ab + mb))
    temps = 2 * tq * Lk * 4
    vmem_limit = int(min(budget, max(32 * 2**20, 2 * blk + temps + (2 << 20))))

    kernel = functools.partial(
        _sdpa_kernel,
        temperature=float(temperature),
        has_mask=has_mask,
        compute_dtype=compute_dtype,
        approx_recip=(jnp.dtype(compute_dtype) != jnp.dtype(jnp.float32)),
    )

    out, attn = pl.pallas_call(
        kernel,
        out_shape=(
            jax.ShapeDtypeStruct((B, Lq, D), q.dtype),
            jax.ShapeDtypeStruct((B, Lq, Lk), attn_dtype),
        ),
        grid_spec=pltpu.PrefetchScalarGridSpec(
            num_scalar_prefetch=0,
            grid=grid,
            in_specs=in_specs,
            out_specs=out_specs,
        ),
        compiler_params=pltpu.CompilerParams(
            dimension_semantics=("parallel", "arbitrary"),
            vmem_limit_bytes=vmem_limit,
        ),
    )(*args)
    return out, attn


def _reference(q, k, v, temperature, mask=None):
    q = q.astype(jnp.float32)
    k = k.astype(jnp.float32)
    v = v.astype(jnp.float32)
    attn = jnp.einsum("bqd,bkd->bqk", q, k) / temperature
    if mask is not None:
        if mask.ndim == 2:
            mask = mask[None]
        mask = jnp.broadcast_to(mask != 0, attn.shape)
        attn = jnp.where(mask, -jnp.inf, attn)
    attn = jax.nn.softmax(attn, axis=2)
    out = jnp.einsum("bqk,bkd->bqd", attn, v)
    return out, attn


def _check(name, got, want, atol, rtol):
    got = got.astype(jnp.float32)
    want = want.astype(jnp.float32)
    assert jnp.allclose(got, want, atol=atol, rtol=rtol), (
        f"{name}: max abs err {float(jnp.max(jnp.abs(got - want)))}"
    )


if __name__ == "__main__":
    key = jax.random.PRNGKey(0)

    # ---------- small strict-parity test (f32 compute + f32 attn writeback) ----------
    n_head, batch, lq, lk, d_k = 2, 2, 8, 8, 16
    B = n_head * batch            # torch layout: (n*b) x l x d_k
    temperature = float(d_k) ** 0.5

    kq, kk, kv, k2 = jax.random.split(key, 4)
    q = jax.random.normal(kq, (B, lq, d_k), dtype=jnp.float32)
    k = jax.random.normal(kk, (B, lk, d_k), dtype=jnp.float32)
    v = jax.random.normal(kv, (B, lk, d_k), dtype=jnp.float32)

    # per-batch bool mask (True => mask out); exercises the batched-mask path, no wrapper cast
    mask_b = jnp.broadcast_to(jnp.triu(jnp.ones((lq, lk), dtype=bool), k=1), (B, lq, lk))

    out, attn = scaled_dot_product_attention(
        q, k, v, temperature, mask=mask_b,
        compute_dtype=jnp.float32, attn_dtype=jnp.float32)
    jax.block_until_ready(out)
    ref_out, ref_attn = _reference(q, k, v, temperature, mask=mask_b)
    _check("f32 masked out", out, ref_out, 1e-5, 1e-5)
    _check("f32 masked attn", attn, ref_attn, 1e-5, 1e-5)

    # mask=None path (separate pallas_call with no mask operand)
    out2, attn2 = scaled_dot_product_attention(
        q, k, v, temperature, mask=None,
        compute_dtype=jnp.float32, attn_dtype=jnp.float32)
    jax.block_until_ready(out2)
    ref_out2, ref_attn2 = _reference(q, k, v, temperature, mask=None)
    _check("f32 nomask out", out2, ref_out2, 1e-5, 1e-5)
    _check("f32 nomask attn", attn2, ref_attn2, 1e-5, 1e-5)

    # default bf16 MXU path + bf16 attn writeback + shared 2-D mask (dedup over batch)
    mask_2d = jnp.triu(jnp.ones((lq, lk), dtype=bool), k=1)
    out3, attn3 = scaled_dot_product_attention(q, k, v, temperature, mask=mask_2d)
    jax.block_until_ready(out3)
    _check("bf16 masked out", out3, ref_out, 5e-2, 5e-2)
    _check("bf16 masked attn", attn3, ref_attn, 3e-2, 3e-2)

    # ---------- medium test: bf16 inputs, shared [1,Lq,Lk] mask, non-divisible Lq tail ----------
    B2, lq2, lk2, d2 = 4, 200, 128, 64          # lq2 not a multiple of 128 -> cdiv + partial block
    temperature2 = float(d2) ** 0.5
    kq2, kk2, kv2 = jax.random.split(k2, 3)
    q2 = jax.random.normal(kq2, (B2, lq2, d2), dtype=jnp.bfloat16)
    k2m = jax.random.normal(kk2, (B2, lk2, d2), dtype=jnp.bfloat16)
    v2m = jax.random.normal(kv2, (B2, lk2, d2), dtype=jnp.bfloat16)
    mask2 = jnp.triu(jnp.ones((lq2, lk2), dtype=bool), k=1)[None]   # (1, Lq, Lk) shared

    out4, attn4 = scaled_dot_product_attention(q2, k2m, v2m, temperature2, mask=mask2,
                                               block_q=128)
    jax.block_until_ready(out4)
    ref_out4, ref_attn4 = _reference(q2, k2m, v2m, temperature2, mask=mask2)
    _check("tiled bf16 out", out4, ref_out4, 1e-1, 1e-1)
    _check("tiled bf16 attn", attn4, ref_attn4, 5e-2, 5e-2)

    print("KERNEL_OK")
</pallas_src>

<mosaic_0001>
module attributes {stable_mosaic.version = 11 : i64} {
  func.func @_sdpa_kernel(%arg0: i32, %arg1: i32, %arg2: memref<1x8x16xf32, #tpu.memory_space<vmem>>, %arg3: memref<1x8x16xf32, #tpu.memory_space<vmem>>, %arg4: memref<1x8x16xf32, #tpu.memory_space<vmem>>, %arg5: memref<1x8x8xi32, #tpu.memory_space<vmem>>, %arg6: memref<1x8x16xf32, #tpu.memory_space<vmem>>, %arg7: memref<1x8x8xf32, #tpu.memory_space<vmem>>) attributes {dimension_semantics = [#tpu.dimension_semantics<parallel>, #tpu.dimension_semantics<arbitrary>], iteration_bounds = array<i64: 4, 1>, scalar_prefetch = 0 : i64, scratch_operands = 0 : i64, tpu.core_type = #tpu.core_type<tc>, window_params = [{transform_indices = @transform_0, window_bounds = array<i64: 1, 8, 16>}, {transform_indices = @transform_1, window_bounds = array<i64: 1, 8, 16>}, {transform_indices = @transform_2, window_bounds = array<i64: 1, 8, 16>}, {transform_indices = @transform_3, window_bounds = array<i64: 1, 8, 8>}, {transform_indices = @transform_4, window_bounds = array<i64: 1, 8, 16>}, {transform_indices = @transform_5, window_bounds = array<i64: 1, 8, 8>}]} {
    %c0 = arith.constant 0 : index
    %c0_0 = arith.constant 0 : index
    %c0_1 = arith.constant 0 : index
    %0 = vector.load %arg2[%c0, %c0_0, %c0_1] : memref<1x8x16xf32, #tpu.memory_space<vmem>>, vector<1x8x16xf32>
    %1 = vector.shape_cast %0 : vector<1x8x16xf32> to vector<8x16xf32>
    %cst = arith.constant 2.500000e-01 : f32
    %2 = vector.broadcast %cst : f32 to vector<8x16xf32>
    %3 = arith.mulf %1, %2 : vector<8x16xf32>
    %c0_2 = arith.constant 0 : index
    %c0_3 = arith.constant 0 : index
    %c0_4 = arith.constant 0 : index
    %4 = vector.load %arg3[%c0_2, %c0_3, %c0_4] : memref<1x8x16xf32, #tpu.memory_space<vmem>>, vector<1x8x16xf32>
    %5 = vector.shape_cast %4 : vector<1x8x16xf32> to vector<8x16xf32>
    %c0_5 = arith.constant 0 : index
    %c0_6 = arith.constant 0 : index
    %c0_7 = arith.constant 0 : index
    %6 = vector.load %arg4[%c0_5, %c0_6, %c0_7] : memref<1x8x16xf32, #tpu.memory_space<vmem>>, vector<1x8x16xf32>
    %7 = vector.shape_cast %6 : vector<1x8x16xf32> to vector<8x16xf32>
    %cst_8 = arith.constant dense<0.000000e+00> : vector<8x8xf32>
    %8 = tpu.matmul %3, %5, %cst_8 {dimension_numbers = #tpu.dot_dimension_numbers<[1], [1], [0], [0], [0, 0, 1, 0], [], []>} : vector<8x16xf32>, vector<8x16xf32>, vector<8x8xf32> -> vector<8x8xf32>
    %c0_9 = arith.constant 0 : index
    %c0_10 = arith.constant 0 : index
    %c0_11 = arith.constant 0 : index
    %9 = vector.load %arg5[%c0_9, %c0_10, %c0_11] : memref<1x8x8xi32, #tpu.memory_space<vmem>>, vector<1x8x8xi32>
    %10 = vector.shape_cast %9 : vector<1x8x8xi32> to vector<8x8xi32>
    %cst_12 = arith.constant dense<0> : vector<8x8xi32>
    %11 = arith.cmpi ne, %10, %cst_12 : vector<8x8xi32>
    %cst_13 = arith.constant -1.000000e+30 : f32
    %12 = vector.broadcast %cst_13 : f32 to vector<8x8xf32>
    %13 = arith.select %11, %12, %8 : vector<8x8xi1>, vector<8x8xf32>
    %cst_14 = arith.constant dense<0xFF800000> : vector<8xf32>
    %14 = vector.multi_reduction <maximumf>, %13, %cst_14 [1] : vector<8x8xf32> to vector<8xf32>
    %15 = vector.shape_cast %14 : vector<8xf32> to vector<8x1xf32>
    %16 = vector.broadcast %15 : vector<8x1xf32> to vector<8x8xf32>
    %17 = arith.subf %13, %16 : vector<8x8xf32>
    %18 = math.exp %17 : vector<8x8xf32>
    %cst_15 = arith.constant dense<0.000000e+00> : vector<8xf32>
    %19 = vector.multi_reduction <add>, %18, %cst_15 [1] : vector<8x8xf32> to vector<8xf32>
    %20 = vector.shape_cast %19 : vector<8xf32> to vector<8x1xf32>
    %21 = tpu.reciprocal %20 : vector<8x1xf32> -> vector<8x1xf32>
    %22 = vector.broadcast %21 : vector<8x1xf32> to vector<8x8xf32>
    %23 = arith.mulf %18, %22 : vector<8x8xf32>
    %c0_16 = arith.constant 0 : index
    %c0_17 = arith.constant 0 : index
    %c0_18 = arith.constant 0 : index
    %24 = vector.load %arg7[%c0_16, %c0_17, %c0_18] : memref<1x8x8xf32, #tpu.memory_space<vmem>>, vector<1x8x8xf32>
    %25 = vector.shape_cast %24 : vector<1x8x8xf32> to vector<8x8xf32>
    %26 = vector.shape_cast %23 : vector<8x8xf32> to vector<1x8x8xf32>
    tpu.vector_store %arg7[%c0_16, %c0_17, %c0_18], %26 {strides = array<i32>} : memref<1x8x8xf32, #tpu.memory_space<vmem>>, vector<1x8x8xf32>,
    %cst_19 = arith.constant dense<0.000000e+00> : vector<8x16xf32>
    %27 = tpu.matmul %23, %7, %cst_19 {dimension_numbers = #tpu.dot_dimension_numbers<[1], [0], [0], [1], [0, 0, 1, 1], [], []>} : vector<8x8xf32>, vector<8x16xf32>, vector<8x16xf32> -> vector<8x16xf32>
    %c0_20 = arith.constant 0 : index
    %c0_21 = arith.constant 0 : index
    %c0_22 = arith.constant 0 : index
    %28 = vector.load %arg6[%c0_20, %c0_21, %c0_22] : memref<1x8x16xf32, #tpu.memory_space<vmem>>, vector<1x8x16xf32>
    %29 = vector.shape_cast %28 : vector<1x8x16xf32> to vector<8x16xf32>
    %30 = vector.shape_cast %27 : vector<8x16xf32> to vector<1x8x16xf32>
    tpu.vector_store %arg6[%c0_20, %c0_21, %c0_22], %30 {strides = array<i32>} : memref<1x8x16xf32, #tpu.memory_space<vmem>>, vector<1x8x16xf32>,
    return
  }
  func.func @transform_0(%arg0: i32, %arg1: i32) -> (i32, i32, i32) {
    %c0_i32 = arith.constant 0 : i32
    %c0_i32_0 = arith.constant 0 : i32
    return %arg0, %arg1, %c0_i32 : i32, i32, i32
  }
  func.func @transform_1(%arg0: i32, %arg1: i32) -> (i32, i32, i32) {
    %c0_i32 = arith.constant 0 : i32
    %c0_i32_0 = arith.constant 0 : i32
    %c0_i32_1 = arith.constant 0 : i32
    return %arg0, %c0_i32, %c0_i32_0 : i32, i32, i32
  }
  func.func @transform_2(%arg0: i32, %arg1: i32) -> (i32, i32, i32) {
    %c0_i32 = arith.constant 0 : i32
    %c0_i32_0 = arith.constant 0 : i32
    %c0_i32_1 = arith.constant 0 : i32
    return %arg0, %c0_i32, %c0_i32_0 : i32, i32, i32
  }
  func.func @transform_3(%arg0: i32, %arg1: i32) -> (i32, i32, i32) {
    %c0_i32 = arith.constant 0 : i32
    %c0_i32_0 = arith.constant 0 : i32
    return %arg0, %arg1, %c0_i32 : i32, i32, i32
  }
  func.func @transform_4(%arg0: i32, %arg1: i32) -> (i32, i32, i32) {
    %c0_i32 = arith.constant 0 : i32
    %c0_i32_0 = arith.constant 0 : i32
    return %arg0, %arg1, %c0_i32 : i32, i32, i32
  }
  func.func @transform_5(%arg0: i32, %arg1: i32) -> (i32, i32, i32) {
    %c0_i32 = arith.constant 0 : i32
    %c0_i32_0 = arith.constant 0 : i32
    return %arg0, %arg1, %c0_i32 : i32, i32, i32
  }
}

</mosaic_0001>

<bundles_post_ra>
// kernel: tpu_custom_call.1
= control target key start
LH: loop header
LB: loop body
LE: loop exit
PB: predicated region body
PF: predicated region fallthrough
CT: control target
= control target key end

     0   :  { %s1268_s0 = inlined_call_operand.vmem [shape: f32[4,8,16], index: 0, kind: input, shape index: {}]   ;;  %s1269_s1 = inlined_call_operand.hbm [shape: f32[4,8,16], index: 1, kind: input, shape index: {}]   ;;  %s1270_s2 = inlined_call_operand.hbm [shape: f32[4,8,16], index: 2, kind: input, shape index: {}]   ;;  %s1271_s3 = inlined_call_operand.vmem [shape: s32[4,8,8], index: 3, kind: input, shape index: {}]   ;;  %s1272_s4 = inlined_call_operand.hbm [shape: f32[4,8,16], index: 4, kind: output, shape index: {0}]   ;;  %s1273_s5 = inlined_call_operand.hbm [shape: f32[4,8,8], index: 5, kind: output, shape index: {1}]  }
   0x1   :  { %1274 = sst [smem:[#allocation14_spill]] %s1269_s1 }
   0x2   :  { %11 = vsyncpa [#allocation3], 0 }
   0x3   :  { %13 = vsyncpa [#allocation3 + $0x1], 0 }
   0x4   :  { %14 = vsyncpa [#allocation6], 0 }
   0x5   :  { %16 = vsyncpa [#allocation6 + $0x1], 0 }
   0x6   :  { %17 = vsyncpa [#allocation4], 0 }
   0x7   :  { %19 = vsyncpa [#allocation4 + $0x1], 0 }
   0x8   :  { %20 = vsyncpa [#allocation9], 0 }
   0x9   :  { %22 = vsyncpa [#allocation9 + $0x1], 0  ;;  %s1054_s18 = smov 0   ;;  %s1056_s19 = smov 0  }
   0xa   :  { %s1058_s20 = smov 0   ;;  %s1060_s21 = smov 0  }
   0xb   :  { %s1062_s22 = smov 0   ;;  %s1064_s23 = smov 0  }
   0xc LB: > { %s730_s24 = sadd.s32 4294967295, %s1016_s23   ;;  %s731_s25 = sadd.s32 4294967294, %s1016_s23   ;;  %s1016_s23 = sphi %s1064_s23, %s28_s23   ;;  %s1012_s22 = sphi %s1062_s22, %s1286_s22   ;;  %s1008_s21 = sphi %s1060_s21, %s1285_s21   ;;  %s1004_s20 = sphi %s1058_s20, %s1284_s20   ;;  %s1000_s19 = sphi %s1056_s19, %s1283_s19   ;;  %s996_s18 = sphi %s1054_s18, %s1282_s18  }
   0xd   : > { %s40_s26 = sadd.s32 1, %s1012_s22  ;;  %s75_s27 = sadd.s32 1, %s1004_s20 }
   0xe   : > { %p42_p0 = scmp.ge.s32.totalorder %s40_s26, 4  ;;  %p82_p1 = scmp.ne.s32.totalorder %s1004_s20, %s1000_s19 }
   0xf   : > { %p83_p2 = scmp.eq.s32.totalorder %s1016_s23, 0  ;;  %p88_p3 = scmp.ne.s32.totalorder %s1000_s19, %s996_s18 }
  0x10   : > { %s1288_s26 = smov (%p42_p0, %s40_s26), 0  ;;  %p89_p5 = scmp.eq.s32.totalorder %s730_s24, 0 }
  0x11   : > { %p1095_p4 = por %p83_p2, %p82_p1  ;;  %s72_s29 = ssub.s32 %s1012_s22, %s1288_s26 }
  0x12   : > { %p168_p6 = scmp.eq.s32.totalorder %s730_s24, 3  ;;  %p73_p7 = scmp.eq.s32.totalorder %s72_s29, 0 }
  0x13   : > { %p1101_p8 = por %p89_p5, %p88_p3  ;;  %p174_p10 = scmp.eq.s32.totalorder %s731_s25, 3 }
  0x14   : > { %p1105_p9 = por %p168_p6, %p82_p1  ;;  %p790_p12 = scmp.lt.s32.totalorder %s1016_s23, 4 }
  0x15   : > { %s1110_s7 = scalar_select %p73_p7, %s1004_s20, %s75_s27  }
  0x16   : > { %p1112_p11 = por %p174_p10, %p88_p3  ;;  %s1118_s9 = sand.u32 1, %s1004_s20  }
  0x17   : > { %s734_s10 = sshll.u32 %s1118_s9, 3  ;;  %s735_s11 = sshll.u32 %s1012_s22, 7 }
  0x18   : > { %s1279_s1 = sld [smem:[#allocation14_spill]]  ;;  %s236_s15 = scalar_lea.vmem [#allocation2], %s734_s10 }
  0x19   : > { %s243_s16 = sshll.u32 %s236_s15, 4  ;;  %p1127_p13 = pnand %p790_p12, %p1095_p4  ;;  %s244_s16 = int_to_ptr.vmem [resolvable:$true] %s243_s16 }
  0x1a   : > { %p738_p0 = scmp.ge.s32.totalorder %s1016_s23, 1  ;;  %p276_p1 = scmp.lt.s32.totalorder %s1016_s23, 5 }
  0x1b   : > { %s233_s24 = scalar_lea.sflag [#allocation3], %s1118_s9  ;;  %p848_p2 = pneg %p1127_p13 }
  0x1c   : > { %s859_s25 = scalar_lea.vmem %s244_s16, 128  ;;  %s1018_s27 = smov [#allocation2]  }
  0x1d   : > { %p860_p3 = scmp.ne.s32.totalorder %s244_s16, %s859_s25  ;;  %s864_s29 = sshll.u32 %s1018_s27, 4  ;;  %s865_s29 = int_to_ptr.vmem [resolvable:$false] %s864_s29 }
  0x1e   : > { %s241_s14 = scalar_lea.hbm %s1279_s1, %s735_s11  ;;  %s866_s28 = scalar_lea.vmem %s865_s29, 256 }
  0x1f   : > { %p862_p5 = pnand %p860_p3, %p848_p2  ;;  %p867_p4 = scmp.lt.s32.totalorder %s244_s16, %s865_s29 }
  0x20   : > { %p868_p7 = scmp.lt.s32.totalorder %s866_s28, %s859_s25 }
  0x21   : > { %p863_p6 = pneg %p862_p5 }
  0x22   : > { %p869_p10 = por %p868_p7, %p867_p4 }
  0x24   : > { %p870_p12 = pnand %p869_p10, %p863_p6 }
  0x26   : > { %873 = shalt.err (!%p870_p12)
}
  0x27   : > { %779 = dma.hbm_to_vmem [thread:$0]  (!%p1127_p13), %s241_s14, 128, %s244_s16, %s233_s24  }
  0x28   : > { %p1145_p3 = pnand %p738_p0, %p276_p1  ;;  %s259_s25 = scalar_lea.hbm %s1270_s2, %s735_s11 }
  0x29   : > { %s254_s27 = scalar_lea.vmem [#allocation5], %s734_s10  ;;  %s251_s28 = scalar_lea.sflag [#allocation6], %s1118_s9 }
  0x2a   : > { %s261_s29 = sshll.u32 %s254_s27, 4  ;;  %s1019_s14 = smov [#allocation5]   ;;  %s262_s29 = int_to_ptr.vmem [resolvable:$true] %s261_s29 }
  0x2b   : > { %s887_s1 = scalar_lea.vmem %s262_s29, 128  ;;  %s892_s16 = sshll.u32 %s1019_s14, 4  ;;  %s893_s16 = int_to_ptr.vmem [resolvable:$false] %s892_s16 }
  0x2c   : > { %p888_p5 = scmp.ne.s32.totalorder %s262_s29, %s887_s1  ;;  %s894_s24 = scalar_lea.vmem %s893_s16, 256 }
  0x2d   : > { %p895_p0 = scmp.lt.s32.totalorder %s262_s29, %s893_s16  ;;  %p896_p1 = scmp.lt.s32.totalorder %s894_s24, %s887_s1 }
  0x2e   : > { %p890_p6 = pnand %p888_p5, %p848_p2 }
  0x2f   : > { %p897_p7 = por %p896_p1, %p895_p0 }
  0x30   : > { %p891_p4 = pneg %p890_p6 }
  0x32   : > { %p898_p10 = pnand %p897_p7, %p891_p4 }
  0x34   : > { %901 = shalt.err (!%p898_p10)
}
  0x35   : > { %782 = dma.hbm_to_vmem [thread:$0]  (!%p1127_p13), %s259_s25, 128, %s262_s29, %s251_s28  }
  0x36   : > { %280 = sbr.rel (%p1145_p3) target bundleno = 784 (0x310), region = 36  ;;  %s1161_s9 = sand.u32 (!%p1145_p3), 1, %s1000_s19  }
  0x37   : > { %s1164_s10 = sshll.u32 (!%p1145_p3), %s1161_s9, 3  ;;  %s283_s11 = scalar_lea.sflag (!%p1145_p3), [#allocation3], %s1161_s9 }
  0x38   : > { %s286_s1 = scalar_lea.vmem (!%p1145_p3), [#allocation2], %s1164_s10 }
  0x3b   : > { %979 = dma.done.wait (%p1101_p8), %s283_s11, 128  }
  0x3c   : > { %981 = vsyncadd (%p1101_p8), %s283_s11, 4294967168  ;;  %s292_s17 = scalar_lea.sflag [#allocation6], %s1161_s9  ;;  %s295_s12 = scalar_lea.vmem [#allocation5], %s1164_s10 }
  0x3d   : > { %983 = dma.done.wait (%p1101_p8), %s292_s17, 128  }
  0x3e   : > { %985 = vsyncadd (%p1101_p8), %s292_s17, 4294967168  ;;  %p346_p13 = scmp.lt.s32.totalorder %s1008_s21, 3  ;;  %v1020_v0 = vmov 0.0   ;;  %vm1021_vm0 = vmmov 0   ;;  %vm364_vm1 = vcmask 130048   ;;  %v362_v1 = vld [vmem:[%s286_s1] sm:$0xff] }
  0x3f   : > { %758 = vmatprep.subr.mxu0 %v1020_v0  ;;  %760 = vmatprep.mubr.msk.f32.mxu0 %vm1021_vm0, %v1020_v0  ;;  %vm444_vm3 = vcmask 64512   ;;  %v363_v14 = vld [vmem:[%s295_s12] sm:$0xff]  ;;  %s345_s16 = scalar_lea.vmem [#allocation8], %s1164_s10  ;;  %s750_s24 = sshll.u32 %s1008_s21, 7 }
  0x40   : > { %s347_s13 = scalar_select %p346_p13, %s1008_s21, 3  ;;  %763 = vmatprep.subr.mxu1 %v1020_v0  ;;  %765 = vmatprep.mubr.msk.f32.mxu1 %vm1021_vm0, %v1020_v0 }
  0x41   : > { %759 = vmatpush3.xpose.msk.msra.mxu0 %vm364_vm1, %v362_v1  ;;  %764 = vmatpush3.msra.mxu1 %v363_v14  ;;  %s563_s17 = scalar_lea.hbm %s1273_s5, %s750_s24  ;;  %s537_s12 = scalar_lea.sflag [#allocation9], %s1161_s9 }
  0x42   : > { %s743_s15 = sshll.u32 %s347_s13, 3  ;;  %s565_s13 = sshll.u32 %s345_s16, 4  ;;  %s566_s13 = int_to_ptr.vmem [resolvable:$true] %s565_s13 }
  0x43   : > { %s352_s29 = scalar_lea.vmem %s1268_s0, %s743_s15  ;;  %s359_s14 = scalar_lea.vmem %s1271_s3, %s743_s15 }
  0x44   : > { %v360_v2 = vld [vmem:[%s352_s29] sm:$0xff]  ;;  %s902_s15 = scalar_lea.vmem %s566_s13, 128  ;;  %s1022_s25 = smov [#allocation8]  }
  0x45   : > { %v361_v3 = vmul.f32 0.25, %v360_v2  ;;  %v441_v4 = vld [vmem:[%s359_s14] sm:$0xff]  ;;  %p903_p8 = scmp.ne.s32.totalorder %s566_s13, %s902_s15  ;;  %s906_s27 = sshll.u32 %s1022_s25, 4  ;;  %s907_s27 = int_to_ptr.vmem [resolvable:$false] %s906_s27 }
  0x46   : > { %vm442_vm2 = vcmp.ne.s32.totalorder %v441_v4, 0  ;;  %s908_s29 = scalar_lea.vmem %s907_s27, 256  ;;  %p909_p3 = scmp.lt.s32.totalorder %s566_s13, %s907_s27 }
  0x47   : > { %761 = vmatmul.mubr.msk.f32.vlgmr.msra.gmra.mxu0 %vm364_vm1, %v361_v3  ;;  %p904_p2 = pnand %p903_p8, %p1105_p9  ;;  %p910_p5 = scmp.lt.s32.totalorder %s908_s29, %s902_s15 }
  0x49   : > { %p905_p12 = pneg %p904_p2  ;;  %p911_p6 = por %p910_p5, %p909_p3 }
  0x4b   : > { %p912_p4 = pnand %p911_p6, %p905_p12 }
 0x107   : > { %v437_v5 = vpop.f32.mrf.mxu0 }
 0x108   : > { %v443_v6 = vsel %vm442_vm2, -1e+30, %v437_v5 }
 0x109   : > { %v762_v7 = vpop.f32.mrf.mxu0  ;;  %v445_v8 = vsel %vm444_vm3, %v443_v6, -inf }
 0x10a   : > { %446 = vmax.xlane.f32.xlu0 %v445_v8 }
 0x193   : > { %v447_v9 = vpop.xlane.xlu0 %446 }
 0x194   : > { %v448_v10 = vsub.f32 %v443_v6, %v447_v9 }
 0x196   : > { %v449_v11 = vmul.f32 1.442695, %v448_v10 }
 0x198   : > { %842 = vpow2.f32 %v449_v11 }
 0x1a5   : > { %v843_v12 = vpop.eup %842 }
 0x1a6   : > { %v451_v13 = vsel %vm444_vm3, %v843_v12, 0.0 }
 0x1a7   : > { %452 = vadd.xlane.f32.xlu0 %v451_v13 }
 0x230   : > { %v453_v15 = vpop.xlane.xlu0 %452 }
 0x231   : > { %844 = vrcp.f32 %v453_v15 }
 0x23e   : > { %v845_v16 = vpop.eup %844 }
 0x23f   : > { %v455_v17 = vmul.f32 %v845_v16, %v843_v12 }
 0x241   : > { %766 = vmatmul.mubr.msk.f32.vlgmr.msra.gmra.mxu1 %vm444_vm3, %v455_v17  ;;  %456 = vst.msk [vmem:[%s345_s16] sm:$0xff] %vm444_vm3, %v455_v17 }
 0x242   : > { %915 = shalt.err (!%p912_p4)
}
 0x243   : > { %s916_s30 = scalar_lea.hbm %s563_s17, 128  ;;  %s920_s16 = scalar_lea.hbm %s1273_s5, 512 }
 0x244   : > { %p917_p0 = scmp.ne.s32.totalorder %s563_s17, %s916_s30  ;;  %p921_p10 = scmp.lt.s32.totalorder %s563_s17, %s1273_s5 }
 0x245   : > { %p922_p13 = scmp.lt.s32.totalorder %s920_s16, %s916_s30 }
 0x246   : > { %p918_p1 = pnand %p917_p0, %p1105_p9 }
 0x247   : > { %p923_p8 = por %p922_p13, %p921_p10 }
 0x248   : > { %p919_p7 = pneg %p918_p1 }
 0x24a   : > { %p924_p2 = pnand %p923_p8, %p919_p7 }
 0x24c   : > { %927 = shalt.err (!%p924_p2)
}
 0x24d   : > { %773 = dma.vmem_to_hbm [thread:$0]  (%p1105_p9), %s566_s13, 128, %s563_s17, %s537_s12  }
 0x24e   : > { %s338_s15 = scalar_lea.vmem [#allocation7], %s1164_s10  ;;  %s1220_s28 = scalar_lea.hbm %s1272_s4, %s750_s24 }
 0x24f   : > { %s551_s25 = sshll.u32 %s338_s15, 4  ;;  %s532_s30 = scalar_lea.sflag [#allocation4], %s1161_s9  ;;  %s1222_s25 = int_to_ptr.vmem [resolvable:$true] %s551_s25 }
 0x250   : > { %s928_s14 = scalar_lea.vmem %s1222_s25, 128  ;;  %s1023_s21 = smov [#allocation7]  }
 0x251   : > { %p929_p12 = scmp.ne.s32.totalorder %s1222_s25, %s928_s14  ;;  %s932_s10 = sshll.u32 %s1023_s21, 4  ;;  %s933_s10 = int_to_ptr.vmem [resolvable:$false] %s932_s10 }
 0x252   : > { %s934_s24 = scalar_lea.vmem %s933_s10, 256  ;;  %p935_p6 = scmp.lt.s32.totalorder %s1222_s25, %s933_s10 }
 0x253   : > { %p930_p3 = pnand %p929_p12, %p1105_p9  ;;  %p936_p4 = scmp.lt.s32.totalorder %s934_s24, %s928_s14 }
 0x255   : > { %p931_p5 = pneg %p930_p3  ;;  %p937_p0 = por %p936_p4, %p935_p6 }
 0x257   : > { %p938_p1 = pnand %p937_p0, %p931_p5 }
 0x301   : > { %v526_v18 = vpop.f32.mrf.mxu1 }
 0x302   : > { %530 = vst.msk [vmem:[%s338_s15] sm:$0xff] %vm364_vm1, %v526_v18 }
 0x303   : > { %v767_v19 = vpop.f32.mrf.mxu1 }
 0x304   : > { %941 = shalt.err (!%p938_p1)
}
 0x305   : > { %s942_s17 = scalar_lea.hbm %s1220_s28, 128  ;;  %s946_s12 = scalar_lea.hbm %s1272_s4, 512 }
 0x306   : > { %p943_p7 = scmp.ne.s32.totalorder %s1220_s28, %s942_s17  ;;  %p947_p8 = scmp.lt.s32.totalorder %s1220_s28, %s1272_s4 }
 0x307   : > { %p948_p2 = scmp.lt.s32.totalorder %s946_s12, %s942_s17 }
 0x308   : > { %p944_p10 = pnand %p943_p7, %p1105_p9 }
 0x309   : > { %p949_p12 = por %p948_p2, %p947_p8 }
 0x30a   : > { %p945_p13 = pneg %p944_p10 }
 0x30c   : > { %p950_p3 = pnand %p949_p12, %p945_p13 }
 0x30e   : > { %953 = shalt.err (!%p950_p3)
}
 0x30f   : > { %772 = dma.vmem_to_hbm [thread:$0]  (%p1105_p9), %s1222_s25, 128, %s1220_s28, %s532_s30  }
 0x310 PF: > { %p791_p5 = scmp.ge.s32.totalorder %s1016_s23, 2  ;;  %s577_s1 = sand.u32 1, %s996_s18  }
 0x311   : > { %s578_s15 = scalar_lea.sflag [#allocation4], %s577_s1 }
 0x312   : > { %p784_p6 = pnand %p791_p5, %p1112_p11 }
 0x314   : > { %p785_p4 = pneg %p784_p6 }
 0x316   : > { %987 = dma.done.wait (%p785_p4), %s578_s15, 128  }
 0x317   : > { %989 = vsyncadd (%p785_p4), %s578_s15, 4294967168  ;;  %s587_s27 = scalar_lea.sflag [#allocation9], %s577_s1 }
 0x318   : > { %991 = dma.done.wait (%p785_p4), %s587_s27, 128  }
 0x319   : > { %993 = vsyncadd (%p785_p4), %s587_s27, 4294967168  ;;  %s28_s23 = sadd.s32 1, %s1016_s23   ;;  %s1282_s18 = smov %s1000_s19 }
 0x31a   : > { %p25_p0 = scmp.ge.s32.totalorder %s28_s23, 6   ;;  %s1283_s19 = smov %s1004_s20 }
 0x31b   : > { %s1284_s20 = smov %s1110_s7  ;;  %s1285_s21 = smov %s1012_s22 }
 0x31c   : > { %s1286_s22 = smov %s1288_s26  ;;  %27 = sbr.rel (!%p25_p0) target bundleno = 12 (0xc), region = 117 }
 0x321   :  { %592 = vsyncpa [#allocation3], 1 }
 0x322   :  { %594 = vsyncpa [#allocation3 + $0x1], 1 }
 0x323   :  { %595 = vsyncpa [#allocation6], 1 }
 0x324   :  { %597 = vsyncpa [#allocation6 + $0x1], 1 }
 0x325   :  { %598 = vsyncpa [#allocation4], 1 }
 0x326   :  { %600 = vsyncpa [#allocation4 + $0x1], 1 }
 0x327   :  { %601 = vsyncpa [#allocation9], 1 }
 0x328   :  { %603 = vsyncpa [#allocation9 + $0x1], 1 }

</bundles_post_ra>
